<compile_context>
chip_gen: v7x
topology: tpu7x:2x2x1
jax: 0.10.0
libtpu: 0.0.40
codegen_flags: <defaults>
</compile_context>

<pallas_src>
from functools import partial

import jax
import jax.numpy as jnp
from jax.experimental import pallas as pl
from jax.experimental.pallas import tpu as pltpu

LANE = 128
_PREF_WIDTHS = (4096, 2048, 1024, 512, 256, 128)   # lane-dense slab widths
_TARGET_TILE_BYTES = 2 * 1024 * 1024                # ~2 MiB per tile per buffer


def _soft_huber_kernel(z_ref, o_ref, *, abs_delta, sign_delta):
    # z_ref / o_ref: (tile_rows, W) VMEM tiles.  delta is a trace-time constant.
    z = z_ref[...].astype(jnp.float32)
    y = jnp.sqrt(jnp.float32(abs_delta * abs_delta) + z * z) - jnp.float32(abs_delta)
    o_ref[...] = (jnp.float32(sign_delta) * y).astype(o_ref.dtype)


def _soft_huber_jnp(z, delta):
    # Same math as the kernel, in plain jnp (used for tiny ragged tails).
    ad = abs(float(delta))
    sg = 1.0 if float(delta) >= 0.0 else -1.0
    zf = z.astype(jnp.float32)
    return (sg * (jnp.sqrt(jnp.float32(ad * ad) + zf * zf) - jnp.float32(ad))).astype(z.dtype)


def _pick_width(n):
    for w in _PREF_WIDTHS:
        if n % w == 0:
            return w
    return None


def _run_slab(flat_aligned, delta):
    """Run the kernel over a 1-D array whose size is a multiple of 128."""
    total = flat_aligned.size
    dtype = flat_aligned.dtype
    itemsize = jnp.dtype(dtype).itemsize
    # Sublanes per packed vreg tile: 8 (32-bit), 16 (16-bit), 32 (8-bit).
    pack_rows = max(8, 8 * (4 // max(1, itemsize)))

    w = _pick_width(total)
    assert w is not None, "caller must pass a 128-aligned element count"
    rows = total // w
    slab = flat_aligned.reshape(rows, w)

    # ~2 MiB per tile, rounded down to a packed-sublane multiple.
    tile_rows = max(pack_rows,
                    (_TARGET_TILE_BYTES // (w * itemsize)) // pack_rows * pack_rows)
    # Keep at least 2 grid blocks for medium inputs so the "parallel" axis can
    # shard across both TensorCores on v7x.
    if rows >= 2 * pack_rows:
        half = ((rows + 1) // 2 + pack_rows - 1) // pack_rows * pack_rows
        tile_rows = min(tile_rows, half)
    tile_rows = min(tile_rows, rows)

    grid = (pl.cdiv(rows, tile_rows),)
    out = pl.pallas_call(
        partial(_soft_huber_kernel,
                abs_delta=abs(float(delta)),
                sign_delta=1.0 if float(delta) >= 0.0 else -1.0),
        out_shape=jax.ShapeDtypeStruct((rows, w), dtype),
        grid_spec=pl.GridSpec(
            grid=grid,
            in_specs=[pl.BlockSpec((tile_rows, w), lambda i: (i, 0))],
            out_specs=pl.BlockSpec((tile_rows, w), lambda i: (i, 0)),
        ),
        compiler_params=pltpu.CompilerParams(
            dimension_semantics=("parallel",),
        ),
    )(slab)
    return out.reshape(-1)


def soft_huber(z: jax.Array, delta: float = 0.05) -> jax.Array:
    orig_shape = z.shape
    total = z.size
    if total == 0:
        return z

    flat = jnp.ravel(z)
    main = (total // LANE) * LANE

    if main == total:
        # Common case: 128-aligned size -> kernel only, zero extra HBM passes.
        return _run_slab(flat, delta).reshape(orig_shape)
    if main == 0:
        # Fewer than 128 elements: plain jnp (single fused pass).
        return _soft_huber_jnp(flat, delta).reshape(orig_shape)

    # Ragged size: kernel over the 128-aligned prefix, <128-element tail in jnp.
    # TODO(synk): the prefix slice + concatenate still copy the prefix once; a
    # fully copy-free ragged path would need manual DMA over pl.ANY refs.
    head = _run_slab(flat[:main], delta)
    tail = _soft_huber_jnp(flat[main:], delta)
    return jnp.concatenate([head, tail]).reshape(orig_shape)


def soft_huber_ref(z, delta=0.05):
    # Reference in the original PyTorch form.
    zf = z.astype(jnp.float32)
    return (delta * (jnp.sqrt(1.0 + (zf / delta) ** 2) - 1.0)).astype(z.dtype)


if __name__ == "__main__":
    key = jax.random.PRNGKey(0)

    # Main case: aligned f32 input matching the module's typical activation use.
    x = jax.random.normal(key, (2, 4, 16, 16), dtype=jnp.float32)
    y = jax.block_until_ready(soft_huber(x, delta=0.05))
    y_ref = soft_huber_ref(x, delta=0.05)
    assert y.shape == x.shape and y.dtype == x.dtype
    assert jnp.allclose(y, y_ref, atol=1e-6, rtol=1e-5)

    # Ragged size: exercises kernel-on-prefix + jnp tail path.
    x2 = jax.random.normal(jax.random.PRNGKey(1), (5, 7, 41), dtype=jnp.float32)
    y2 = jax.block_until_ready(soft_huber(x2, delta=0.05))
    assert jnp.allclose(y2, soft_huber_ref(x2, delta=0.05), atol=1e-6, rtol=1e-5)

    # bf16 path (packed sublanes); compare against the identical-formula jnp math.
    x3 = jax.random.normal(jax.random.PRNGKey(2), (4, 8, 64), dtype=jnp.bfloat16)
    y3 = jax.block_until_ready(soft_huber(x3, delta=0.05))
    assert jnp.allclose(y3.astype(jnp.float32),
                        _soft_huber_jnp(x3, 0.05).astype(jnp.float32),
                        atol=1e-2, rtol=1e-2)

    print("KERNEL_OK")
</pallas_src>

<mosaic_0001>
module attributes {stable_mosaic.version = 11 : i64} {
  func.func @_soft_huber_kernel(%arg0: i32, %arg1: memref<1x2048xf32, #tpu.memory_space<vmem>>, %arg2: memref<1x2048xf32, #tpu.memory_space<vmem>>) attributes {dimension_semantics = [#tpu.dimension_semantics<parallel>], iteration_bounds = array<i64: 1>, scalar_prefetch = 0 : i64, scratch_operands = 0 : i64, tpu.core_type = #tpu.core_type<tc>, window_params = [{transform_indices = @transform_0, window_bounds = array<i64: 1, 2048>}, {transform_indices = @transform_1, window_bounds = array<i64: 1, 2048>}]} {
    %c0 = arith.constant 0 : index
    %c0_0 = arith.constant 0 : index
    %0 = vector.load %arg1[%c0, %c0_0] : memref<1x2048xf32, #tpu.memory_space<vmem>>, vector<1x2048xf32>
    %1 = arith.mulf %0, %0 : vector<1x2048xf32>
    %cst = arith.constant 2.500000e-03 : f32
    %2 = vector.broadcast %cst : f32 to vector<1x2048xf32>
    %3 = arith.addf %2, %1 : vector<1x2048xf32>
    %4 = math.sqrt %3 : vector<1x2048xf32>
    %cst_1 = arith.constant 5.000000e-02 : f32
    %5 = vector.broadcast %cst_1 : f32 to vector<1x2048xf32>
    %6 = arith.subf %4, %5 : vector<1x2048xf32>
    %cst_2 = arith.constant 1.000000e+00 : f32
    %7 = vector.broadcast %cst_2 : f32 to vector<1x2048xf32>
    %8 = arith.mulf %7, %6 : vector<1x2048xf32>
    %c0_3 = arith.constant 0 : index
    %c0_4 = arith.constant 0 : index
    %9 = vector.load %arg2[%c0_3, %c0_4] : memref<1x2048xf32, #tpu.memory_space<vmem>>, vector<1x2048xf32>
    tpu.vector_store %arg2[%c0_3, %c0_4], %8 {strides = array<i32>} : memref<1x2048xf32, #tpu.memory_space<vmem>>, vector<1x2048xf32>,
    return
  }
  func.func @transform_0(%arg0: i32) -> (i32, i32) {
    %c0_i32 = arith.constant 0 : i32
    %c0_i32_0 = arith.constant 0 : i32
    return %arg0, %c0_i32 : i32, i32
  }
  func.func @transform_1(%arg0: i32) -> (i32, i32) {
    %c0_i32 = arith.constant 0 : i32
    %c0_i32_0 = arith.constant 0 : i32
    return %arg0, %c0_i32 : i32, i32
  }
}

</mosaic_0001>

<bundles_post_ra>
// kernel: tpu_custom_call.1
= control target key start
LH: loop header
LB: loop body
LE: loop exit
PB: predicated region body
PF: predicated region fallthrough
CT: control target
= control target key end

     0   :  { %6 = vsyncpa [#allocation3], 0  ;;  %s152_s0 = inlined_call_operand.hbm [shape: f32[1,2048], index: 0, kind: input, shape index: {}]   ;;  %s153_s1 = inlined_call_operand.hbm [shape: f32[1,2048], index: 1, kind: output, shape index: {}]  }
   0x1   :  { %7 = vsyncpa [#allocation4], 0  ;;  %s116_s6 = smov [#allocation2]   ;;  %s68_s10 = scalar_lea.hbm %s152_s0, 256 }
   0x2   :  { %s14_s7 = sshll.u32 %s116_s6, 4  ;;  %p69_p0 = scmp.ne.s32.totalorder %s152_s0, %s68_s10  ;;  %s15_s7 = int_to_ptr.vmem [resolvable:$true] %s14_s7 }
   0x3   :  { %p72_p1 = scmp.lt.u32.totalorder %s68_s10, %s152_s0 }
   0x5   :  { %p74_p2 = pnand %p72_p1, %p69_p0 }
   0x7   :  { %77 = shalt.err (!%p74_p2)
}
   0x8   :  { %s78_s15 = scalar_lea.vmem %s15_s7, 256  ;;  %p83_p4 = scmp.lt.s32.totalorder %s15_s7, %s15_s7 }
   0x9   :  { %p79_p3 = scmp.ne.s32.totalorder %s15_s7, %s78_s15  ;;  %p84_p5 = scmp.lt.s32.totalorder %s78_s15, %s78_s15 }
   0xb   :  { %p85_p6 = por %p84_p5, %p83_p4 }
   0xd   :  { %p86_p7 = pnand %p85_p6, %p79_p3 }
   0xf   :  { %89 = shalt.err (!%p86_p7)
}
  0x10   :  { %17 = dma.hbm_to_vmem [thread:$0]  %s152_s0, 256, %s15_s7, [#allocation3]  }
  0x11   :  { %112 = dma.done.wait [#allocation3], 256  }
  0x12   :  { %113 = vsyncadd [#allocation3], 4294967040  ;;  %v21_v0 = vld [vmem:[#allocation2] sm:$0xff]  ;;  %v22_v1 = vld [vmem:[#allocation2 + $0x8] sm:$0xff]  ;;  %s117_s0 = smov [#allocation5]  }
  0x13   :  { %v23_v2 = vmul.f32 %v21_v0, %v21_v0  ;;  %v24_v3 = vmul.f32 %v22_v1, %v22_v1  ;;  %s51_s18 = sshll.u32 %s117_s0, 4  ;;  %s52_s18 = int_to_ptr.vmem [resolvable:$true] %s51_s18 }
  0x14   :  { %s90_s19 = scalar_lea.vmem %s52_s18, 256  ;;  %p95_p9 = scmp.lt.s32.totalorder %s52_s18, %s52_s18 }
  0x15   :  { %v25_v4 = vadd.f32 0.0025, %v23_v2  ;;  %v26_v5 = vadd.f32 0.0025, %v24_v3  ;;  %p91_p8 = scmp.ne.s32.totalorder %s52_s18, %s90_s19  ;;  %p96_p10 = scmp.lt.s32.totalorder %s90_s19, %s90_s19 }
  0x17   :  { %64 = vrsqrt.f32 %v25_v4  ;;  %vm29_vm0 = vcmp.eq.f32.partialorder %v25_v4, inf  ;;  %v32_v7 = vand.u32 2147483648, %v25_v4  ;;  %vm31_vm1 = vcmp.eq.f32.partialorder %v25_v4, 0.0  ;;  %p97_p11 = por %p96_p10, %p95_p9 }
  0x18   :  { %66 = vrsqrt.f32 %v26_v5  ;;  %vm36_vm2 = vcmp.eq.f32.partialorder %v26_v5, inf  ;;  %v39_v10 = vand.u32 2147483648, %v26_v5  ;;  %vm38_vm3 = vcmp.eq.f32.partialorder %v26_v5, 0.0 }
  0x19   :  { %p98_p12 = pnand %p97_p11, %p91_p8 }
  0x21   :  { %v65_v6 = vpop.eup %64 }
  0x22   :  { %v67_v8 = vpop.eup %66  ;;  %v28_v9 = vmul.f32 %v65_v6, %v25_v4 }
  0x23   :  { %v35_v11 = vmul.f32 %v67_v8, %v26_v5 }
  0x24   :  { %v30_v12 = vsel %vm29_vm0, %v25_v4, %v28_v9 }
  0x25   :  { %v33_v13 = vsel %vm31_vm1, %v32_v7, %v30_v12  ;;  %v37_v14 = vsel %vm36_vm2, %v26_v5, %v35_v11 }
  0x26   :  { %v60_v15 = vadd.f32 -0.05, %v33_v13  ;;  %v40_v16 = vsel %vm38_vm3, %v39_v10, %v37_v14 }
  0x27   :  { %v61_v17 = vadd.f32 -0.05, %v40_v16 }
  0x28   :  { %43 = vst [vmem:[#allocation5] sm:$0xff] %v60_v15 }
  0x29   :  { %44 = vst [vmem:[#allocation5 + $0x8] sm:$0xff] %v61_v17 }
  0x2a   :  { %101 = shalt.err (!%p98_p12)
}
  0x2b   :  { %s102_s22 = scalar_lea.hbm %s153_s1, 256 }
  0x2c   :  { %p103_p13 = scmp.ne.s32.totalorder %s153_s1, %s102_s22  ;;  %p106_p0 = scmp.lt.u32.totalorder %s102_s22, %s153_s1 }
  0x2e   :  { %p108_p1 = pnand %p106_p0, %p103_p13 }
  0x30   :  { %111 = shalt.err (!%p108_p1)
}
  0x31   :  { %54 = dma.vmem_to_hbm [thread:$0]  %s52_s18, 256, %s153_s1, [#allocation4]  }
  0x32   :  { %114 = dma.done.wait [#allocation4], 256  }
  0x33   :  { %115 = vsyncadd [#allocation4], 4294967040 }
  0x34   :  { %58 = vsyncpa [#allocation3], 1 }
  0x35   :  { %59 = vsyncpa [#allocation4], 1 }

</bundles_post_ra>
